<compile_context>
chip_gen: v7x
topology: tpu7x:2x2x1
jax: 0.10.0
libtpu: 0.0.40
codegen_flags: <defaults>
</compile_context>

<pallas_src>
import jax
import jax.numpy as jnp
from jax.experimental import pallas as pl
from jax.experimental.pallas import tpu as pltpu


def _pick_row_tile(H: int, W: int, N: int) -> int:
    """Input rows per grid step: a multiple-of-8 divisor of H (else full H),
    sized for ~2 MiB of HBM traffic per step, keeping >=4 grid steps if possible."""
    if H % 8 != 0:
        return H  # full extent is always a legal block dim
    target = max(8, min(256, 32768 // max(W, 1)))
    th = 8
    for t in range(8, min(H, 256) + 1, 8):
        if H % t == 0 and t <= target:
            th = t
    while th >= 16 and N * (H // th) < 4 and H % (th // 2) == 0 and (th // 2) % 8 == 0:
        th //= 2
    return th


def out_block_pallas(x, w1, b1, w2, b2):
    """x: [N, Cin, H, W] (NCHW).  w1: [Cin, Cout, 2, 2], b1: [Cout],
    w2: [Ncls, Cout, 1, 1], b2: [Ncls].  Returns [N, Ncls, 2H, 2W]."""
    N, Cin, H, W = x.shape
    Ncls = w2.shape[0]

    # ---- wrapper-side weight folding (tiny) ----------------------------------
    w2m = w2[:, :, 0, 0]                                    # [Ncls, Cout]
    wf = jnp.einsum("co,iokl->ckli", w2m, w1)               # [c, ki, kj, i]
    # lane-parity weight table: wl[c*2+ki, i, 0, 2w+kj] = Wf[c, ki, kj, i]
    wl = jnp.transpose(wf, (0, 1, 3, 2)).reshape(Ncls * 2, Cin, 1, 2)
    wl = jnp.tile(wl, (1, 1, 1, W)).astype(jnp.float32)     # [2*Ncls, Cin, 1, 2W]
    bl = (w2m @ b1 + b2).astype(jnp.float32).reshape(Ncls, 1, 1)
    # exact 0/1 lane-duplication matrix: (x @ dup)[:, 2w+kj] = x[:, w]
    dup = jnp.repeat(jnp.eye(W, dtype=jnp.float32), 2, axis=1)   # [W, 2W]

    TH = _pick_row_tile(H, W, N)
    chunks, r = [], 0
    while r < TH:                      # static 8-row chunks (tail may be smaller)
        sz = min(8, TH - r)
        chunks.append((r, sz))
        r += sz

    def kernel(x_ref, d_ref, wl_ref, bl_ref, o_ref, xd_ref):
        # x_ref: (1, Cin, TH, W)   o_ref: (1, Ncls, TH, 4W)   xd_ref: (Cin, TH, 2W)
        d = d_ref[...]
        # 1) MXU: lane-duplicate every channel once per grid step (exact: 0/1 RHS).
        for i in range(Cin):
            xd_ref[i] = jnp.dot(
                x_ref[0, i], d,
                precision=jax.lax.Precision.HIGHEST,
                preferred_element_type=jnp.float32)
        # 2) VPU: per row-chunk, per (class, ki): broadcast-multiply-add over the
        #    Cin channels in kj-interleaved 2W lane space; dense half-row stores.
        for (rs, sz) in chunks:
            xch = [xd_ref[i, rs:rs + sz, :] for i in range(Cin)]
            for c in range(Ncls):
                for ki in range(2):
                    q = 2 * c + ki
                    acc = xch[0] * wl_ref[q, 0]
                    for i in range(1, Cin):
                        acc = acc + xch[i] * wl_ref[q, i]
                    acc = acc + bl_ref[c]
                    o_ref[0, c, rs:rs + sz, ki * 2 * W:(ki + 1) * 2 * W] = (
                        acc.astype(o_ref.dtype))

    out = pl.pallas_call(
        kernel,
        out_shape=jax.ShapeDtypeStruct((N, Ncls, H, 4 * W), x.dtype),
        grid_spec=pltpu.PrefetchScalarGridSpec(
            num_scalar_prefetch=0,
            grid=(N, H // TH),
            in_specs=[
                pl.BlockSpec((1, Cin, TH, W), lambda n, h: (n, 0, h, 0)),
                pl.BlockSpec((W, 2 * W), lambda n, h: (0, 0)),
                pl.BlockSpec((Ncls * 2, Cin, 1, 2 * W), lambda n, h: (0, 0, 0, 0)),
                pl.BlockSpec((Ncls, 1, 1), lambda n, h: (0, 0, 0)),
            ],
            out_specs=pl.BlockSpec((1, Ncls, TH, 4 * W), lambda n, h: (n, 0, h, 0)),
            scratch_shapes=[pltpu.VMEM((Cin, TH, 2 * W), jnp.float32)],
        ),
        compiler_params=pltpu.CompilerParams(
            dimension_semantics=("parallel", "parallel")),
    )(x, dup, wl, bl)

    # Pure metadata: (N, Ncls, H, 4W) and (N, Ncls, 2H, 2W) share the same layout.
    # TODO(synk): optional bf16 output (halves output HBM bytes) if downstream accepts it.
    # TODO(synk): for tiny images, batch several images per grid step (leading block dim > 1).
    # TODO(synk): for very wide images (W >~ 1k) the exact lane-duplication matmul is O(W)
    #             per pixel; tile W (or use lane-strided stores once supported) in that regime.
    return out.reshape(N, Ncls, 2 * H, 2 * W)


def out_block_reference(x, w1, b1, w2, b2):
    """Pure-JAX reference with the original two-layer math."""
    N, Cin, H, W = x.shape
    Cout = w1.shape[1]
    # ConvTranspose2d, kernel=2, stride=2 (no overlap).
    z = jnp.einsum("nchw,cokl->nohkwl", x, w1) + b1[None, :, None, None, None, None]
    z = z.reshape(N, Cout, 2 * H, 2 * W)
    # 1x1 Conv2d.
    y = jnp.einsum("nohw,ko->nkhw", z, w2[:, :, 0, 0]) + b2[None, :, None, None]
    return y


if __name__ == "__main__":
    # Module config: in_channels=4, out_channels=4, num_classes=3.
    N, Cin, Cout, Ncls, H, W = 2, 4, 4, 3, 16, 16

    key = jax.random.PRNGKey(0)
    kx, k1, kb1, k2, kb2 = jax.random.split(key, 5)
    x = jax.random.normal(kx, (N, Cin, H, W), dtype=jnp.float32)
    w1 = jax.random.normal(k1, (Cin, Cout, 2, 2), dtype=jnp.float32) * 0.1
    b1 = jax.random.normal(kb1, (Cout,), dtype=jnp.float32) * 0.1
    w2 = jax.random.normal(k2, (Ncls, Cout, 1, 1), dtype=jnp.float32) * 0.1
    b2 = jax.random.normal(kb2, (Ncls,), dtype=jnp.float32) * 0.1

    y = out_block_pallas(x, w1, b1, w2, b2)
    y = jax.block_until_ready(y)

    y_ref = out_block_reference(x, w1, b1, w2, b2)
    assert y.shape == (N, Ncls, 2 * H, 2 * W), y.shape
    assert jnp.allclose(y, y_ref, atol=1e-4, rtol=1e-4), "mismatch vs reference"

    print("KERNEL_OK")
</pallas_src>

<mosaic_0001>
module attributes {stable_mosaic.version = 11 : i64} {
  func.func @kernel(%arg0: i32, %arg1: i32, %arg2: memref<1x4x8x16xf32, #tpu.memory_space<vmem>>, %arg3: memref<16x32xf32, #tpu.memory_space<vmem>>, %arg4: memref<6x4x1x32xf32, #tpu.memory_space<vmem>>, %arg5: memref<3x1x1xf32, #tpu.memory_space<vmem>>, %arg6: memref<1x3x8x64xf32, #tpu.memory_space<vmem>>, %arg7: memref<4x8x32xf32, #tpu.memory_space<vmem>>) attributes {dimension_semantics = [#tpu.dimension_semantics<parallel>, #tpu.dimension_semantics<parallel>], iteration_bounds = array<i64: 2, 2>, scalar_prefetch = 0 : i64, scratch_operands = 1 : i64, tpu.core_type = #tpu.core_type<tc>, window_params = [{transform_indices = @transform_0, window_bounds = array<i64: 1, 4, 8, 16>}, {pipeline_mode = #tpu.pipeline_mode<synchronous>, transform_indices = @transform_1, window_bounds = array<i64: 16, 32>}, {pipeline_mode = #tpu.pipeline_mode<synchronous>, transform_indices = @transform_2, window_bounds = array<i64: 6, 4, 1, 32>}, {pipeline_mode = #tpu.pipeline_mode<synchronous>, transform_indices = @transform_3, window_bounds = array<i64: 3, 1, 1>}, {transform_indices = @transform_4, window_bounds = array<i64: 1, 3, 8, 64>}]} {
    %c0 = arith.constant 0 : index
    %c0_0 = arith.constant 0 : index
    %0 = vector.load %arg3[%c0, %c0_0] : memref<16x32xf32, #tpu.memory_space<vmem>>, vector<16x32xf32>
    %c0_1 = arith.constant 0 : index
    %c0_2 = arith.constant 0 : index
    %c0_3 = arith.constant 0 : index
    %c0_4 = arith.constant 0 : index
    %1 = vector.load %arg2[%c0_1, %c0_2, %c0_3, %c0_4] : memref<1x4x8x16xf32, #tpu.memory_space<vmem>>, vector<1x1x8x16xf32>
    %2 = vector.shape_cast %1 : vector<1x1x8x16xf32> to vector<8x16xf32>
    %cst = arith.constant dense<0.000000e+00> : vector<8x32xf32>
    %3 = tpu.matmul %2, %0, %cst {dimension_numbers = #tpu.dot_dimension_numbers<[1], [0], [0], [1], [0, 0, 1, 1], [], []>, precision = #tpu.contract_precision<fp32>} : vector<8x16xf32>, vector<16x32xf32>, vector<8x32xf32> -> vector<8x32xf32>
    %c0_5 = arith.constant 0 : index
    %c0_6 = arith.constant 0 : index
    %c0_7 = arith.constant 0 : index
    %4 = vector.load %arg7[%c0_5, %c0_6, %c0_7] : memref<4x8x32xf32, #tpu.memory_space<vmem>>, vector<1x8x32xf32>
    %5 = vector.shape_cast %4 : vector<1x8x32xf32> to vector<8x32xf32>
    %6 = vector.shape_cast %3 : vector<8x32xf32> to vector<1x8x32xf32>
    tpu.vector_store %arg7[%c0_5, %c0_6, %c0_7], %6 {strides = array<i32>} : memref<4x8x32xf32, #tpu.memory_space<vmem>>, vector<1x8x32xf32>,
    %c0_8 = arith.constant 0 : index
    %c1 = arith.constant 1 : index
    %c0_9 = arith.constant 0 : index
    %c0_10 = arith.constant 0 : index
    %7 = vector.load %arg2[%c0_8, %c1, %c0_9, %c0_10] : memref<1x4x8x16xf32, #tpu.memory_space<vmem>>, vector<1x1x8x16xf32>
    %8 = vector.shape_cast %7 : vector<1x1x8x16xf32> to vector<8x16xf32>
    %cst_11 = arith.constant dense<0.000000e+00> : vector<8x32xf32>
    %9 = tpu.matmul %8, %0, %cst_11 {dimension_numbers = #tpu.dot_dimension_numbers<[1], [0], [0], [1], [0, 0, 1, 1], [], []>, precision = #tpu.contract_precision<fp32>} : vector<8x16xf32>, vector<16x32xf32>, vector<8x32xf32> -> vector<8x32xf32>
    %c1_12 = arith.constant 1 : index
    %c0_13 = arith.constant 0 : index
    %c0_14 = arith.constant 0 : index
    %10 = vector.load %arg7[%c1_12, %c0_13, %c0_14] : memref<4x8x32xf32, #tpu.memory_space<vmem>>, vector<1x8x32xf32>
    %11 = vector.shape_cast %10 : vector<1x8x32xf32> to vector<8x32xf32>
    %12 = vector.shape_cast %9 : vector<8x32xf32> to vector<1x8x32xf32>
    tpu.vector_store %arg7[%c1_12, %c0_13, %c0_14], %12 {strides = array<i32>} : memref<4x8x32xf32, #tpu.memory_space<vmem>>, vector<1x8x32xf32>,
    %c0_15 = arith.constant 0 : index
    %c2 = arith.constant 2 : index
    %c0_16 = arith.constant 0 : index
    %c0_17 = arith.constant 0 : index
    %13 = vector.load %arg2[%c0_15, %c2, %c0_16, %c0_17] : memref<1x4x8x16xf32, #tpu.memory_space<vmem>>, vector<1x1x8x16xf32>
    %14 = vector.shape_cast %13 : vector<1x1x8x16xf32> to vector<8x16xf32>
    %cst_18 = arith.constant dense<0.000000e+00> : vector<8x32xf32>
    %15 = tpu.matmul %14, %0, %cst_18 {dimension_numbers = #tpu.dot_dimension_numbers<[1], [0], [0], [1], [0, 0, 1, 1], [], []>, precision = #tpu.contract_precision<fp32>} : vector<8x16xf32>, vector<16x32xf32>, vector<8x32xf32> -> vector<8x32xf32>
    %c2_19 = arith.constant 2 : index
    %c0_20 = arith.constant 0 : index
    %c0_21 = arith.constant 0 : index
    %16 = vector.load %arg7[%c2_19, %c0_20, %c0_21] : memref<4x8x32xf32, #tpu.memory_space<vmem>>, vector<1x8x32xf32>
    %17 = vector.shape_cast %16 : vector<1x8x32xf32> to vector<8x32xf32>
    %18 = vector.shape_cast %15 : vector<8x32xf32> to vector<1x8x32xf32>
    tpu.vector_store %arg7[%c2_19, %c0_20, %c0_21], %18 {strides = array<i32>} : memref<4x8x32xf32, #tpu.memory_space<vmem>>, vector<1x8x32xf32>,
    %c0_22 = arith.constant 0 : index
    %c3 = arith.constant 3 : index
    %c0_23 = arith.constant 0 : index
    %c0_24 = arith.constant 0 : index
    %19 = vector.load %arg2[%c0_22, %c3, %c0_23, %c0_24] : memref<1x4x8x16xf32, #tpu.memory_space<vmem>>, vector<1x1x8x16xf32>
    %20 = vector.shape_cast %19 : vector<1x1x8x16xf32> to vector<8x16xf32>
    %cst_25 = arith.constant dense<0.000000e+00> : vector<8x32xf32>
    %21 = tpu.matmul %20, %0, %cst_25 {dimension_numbers = #tpu.dot_dimension_numbers<[1], [0], [0], [1], [0, 0, 1, 1], [], []>, precision = #tpu.contract_precision<fp32>} : vector<8x16xf32>, vector<16x32xf32>, vector<8x32xf32> -> vector<8x32xf32>
    %c3_26 = arith.constant 3 : index
    %c0_27 = arith.constant 0 : index
    %c0_28 = arith.constant 0 : index
    %22 = vector.load %arg7[%c3_26, %c0_27, %c0_28] : memref<4x8x32xf32, #tpu.memory_space<vmem>>, vector<1x8x32xf32>
    %23 = vector.shape_cast %22 : vector<1x8x32xf32> to vector<8x32xf32>
    %24 = vector.shape_cast %21 : vector<8x32xf32> to vector<1x8x32xf32>
    tpu.vector_store %arg7[%c3_26, %c0_27, %c0_28], %24 {strides = array<i32>} : memref<4x8x32xf32, #tpu.memory_space<vmem>>, vector<1x8x32xf32>,
    %c0_29 = arith.constant 0 : index
    %c0_30 = arith.constant 0 : index
    %c0_31 = arith.constant 0 : index
    %25 = vector.load %arg7[%c0_29, %c0_30, %c0_31] : memref<4x8x32xf32, #tpu.memory_space<vmem>>, vector<1x8x32xf32>
    %26 = vector.shape_cast %25 : vector<1x8x32xf32> to vector<8x32xf32>
    %c1_32 = arith.constant 1 : index
    %c0_33 = arith.constant 0 : index
    %c0_34 = arith.constant 0 : index
    %27 = vector.load %arg7[%c1_32, %c0_33, %c0_34] : memref<4x8x32xf32, #tpu.memory_space<vmem>>, vector<1x8x32xf32>
    %28 = vector.shape_cast %27 : vector<1x8x32xf32> to vector<8x32xf32>
    %c2_35 = arith.constant 2 : index
    %c0_36 = arith.constant 0 : index
    %c0_37 = arith.constant 0 : index
    %29 = vector.load %arg7[%c2_35, %c0_36, %c0_37] : memref<4x8x32xf32, #tpu.memory_space<vmem>>, vector<1x8x32xf32>
    %30 = vector.shape_cast %29 : vector<1x8x32xf32> to vector<8x32xf32>
    %c3_38 = arith.constant 3 : index
    %c0_39 = arith.constant 0 : index
    %c0_40 = arith.constant 0 : index
    %31 = vector.load %arg7[%c3_38, %c0_39, %c0_40] : memref<4x8x32xf32, #tpu.memory_space<vmem>>, vector<1x8x32xf32>
    %32 = vector.shape_cast %31 : vector<1x8x32xf32> to vector<8x32xf32>
    %c0_41 = arith.constant 0 : index
    %c0_42 = arith.constant 0 : index
    %c0_43 = arith.constant 0 : index
    %c0_44 = arith.constant 0 : index
    %33 = vector.load %arg4[%c0_41, %c0_42, %c0_43, %c0_44] : memref<6x4x1x32xf32, #tpu.memory_space<vmem>>, vector<1x1x1x32xf32>
    %34 = vector.shape_cast %33 : vector<1x1x1x32xf32> to vector<1x32xf32>
    %35 = vector.broadcast %34 : vector<1x32xf32> to vector<8x32xf32>
    %36 = arith.mulf %26, %35 : vector<8x32xf32>
    %c0_45 = arith.constant 0 : index
    %c1_46 = arith.constant 1 : index
    %c0_47 = arith.constant 0 : index
    %c0_48 = arith.constant 0 : index
    %37 = vector.load %arg4[%c0_45, %c1_46, %c0_47, %c0_48] : memref<6x4x1x32xf32, #tpu.memory_space<vmem>>, vector<1x1x1x32xf32>
    %38 = vector.shape_cast %37 : vector<1x1x1x32xf32> to vector<1x32xf32>
    %39 = vector.broadcast %38 : vector<1x32xf32> to vector<8x32xf32>
    %40 = arith.mulf %28, %39 : vector<8x32xf32>
    %41 = arith.addf %36, %40 : vector<8x32xf32>
    %c0_49 = arith.constant 0 : index
    %c2_50 = arith.constant 2 : index
    %c0_51 = arith.constant 0 : index
    %c0_52 = arith.constant 0 : index
    %42 = vector.load %arg4[%c0_49, %c2_50, %c0_51, %c0_52] : memref<6x4x1x32xf32, #tpu.memory_space<vmem>>, vector<1x1x1x32xf32>
    %43 = vector.shape_cast %42 : vector<1x1x1x32xf32> to vector<1x32xf32>
    %44 = vector.broadcast %43 : vector<1x32xf32> to vector<8x32xf32>
    %45 = arith.mulf %30, %44 : vector<8x32xf32>
    %46 = arith.addf %41, %45 : vector<8x32xf32>
    %c0_53 = arith.constant 0 : index
    %c3_54 = arith.constant 3 : index
    %c0_55 = arith.constant 0 : index
    %c0_56 = arith.constant 0 : index
    %47 = vector.load %arg4[%c0_53, %c3_54, %c0_55, %c0_56] : memref<6x4x1x32xf32, #tpu.memory_space<vmem>>, vector<1x1x1x32xf32>
    %48 = vector.shape_cast %47 : vector<1x1x1x32xf32> to vector<1x32xf32>
    %49 = vector.broadcast %48 : vector<1x32xf32> to vector<8x32xf32>
    %50 = arith.mulf %32, %49 : vector<8x32xf32>
    %51 = arith.addf %46, %50 : vector<8x32xf32>
    %c0_57 = arith.constant 0 : index
    %c0_58 = arith.constant 0 : index
    %c0_59 = arith.constant 0 : index
    %52 = vector.load %arg5[%c0_57, %c0_58, %c0_59] : memref<3x1x1xf32, #tpu.memory_space<vmem>>, vector<1x1x1xf32>
    %53 = vector.shape_cast %52 : vector<1x1x1xf32> to vector<1x1xf32>
    %54 = vector.broadcast %53 : vector<1x1xf32> to vector<8x32xf32>
    %55 = arith.addf %51, %54 : vector<8x32xf32>
    %c0_60 = arith.constant 0 : index
    %c0_61 = arith.constant 0 : index
    %c0_62 = arith.constant 0 : index
    %c0_63 = arith.constant 0 : index
    %56 = vector.load %arg6[%c0_60, %c0_61, %c0_62, %c0_63] : memref<1x3x8x64xf32, #tpu.memory_space<vmem>>, vector<1x1x8x32xf32>
    %57 = vector.shape_cast %56 : vector<1x1x8x32xf32> to vector<8x32xf32>
    %58 = vector.shape_cast %55 : vector<8x32xf32> to vector<1x1x8x32xf32>
    tpu.vector_store %arg6[%c0_60, %c0_61, %c0_62, %c0_63], %58 {strides = array<i32>} : memref<1x3x8x64xf32, #tpu.memory_space<vmem>>, vector<1x1x8x32xf32>,
    %c1_64 = arith.constant 1 : index
    %c0_65 = arith.constant 0 : index
    %c0_66 = arith.constant 0 : index
    %c0_67 = arith.constant 0 : index
    %59 = vector.load %arg4[%c1_64, %c0_65, %c0_66, %c0_67] : memref<6x4x1x32xf32, #tpu.memory_space<vmem>>, vector<1x1x1x32xf32>
    %60 = vector.shape_cast %59 : vector<1x1x1x32xf32> to vector<1x32xf32>
    %61 = vector.broadcast %60 : vector<1x32xf32> to vector<8x32xf32>
    %62 = arith.mulf %26, %61 : vector<8x32xf32>
    %c1_68 = arith.constant 1 : index
    %c1_69 = arith.constant 1 : index
    %c0_70 = arith.constant 0 : index
    %c0_71 = arith.constant 0 : index
    %63 = vector.load %arg4[%c1_68, %c1_69, %c0_70, %c0_71] : memref<6x4x1x32xf32, #tpu.memory_space<vmem>>, vector<1x1x1x32xf32>
    %64 = vector.shape_cast %63 : vector<1x1x1x32xf32> to vector<1x32xf32>
    %65 = vector.broadcast %64 : vector<1x32xf32> to vector<8x32xf32>
    %66 = arith.mulf %28, %65 : vector<8x32xf32>
    %67 = arith.addf %62, %66 : vector<8x32xf32>
    %c1_72 = arith.constant 1 : index
    %c2_73 = arith.constant 2 : index
    %c0_74 = arith.constant 0 : index
    %c0_75 = arith.constant 0 : index
    %68 = vector.load %arg4[%c1_72, %c2_73, %c0_74, %c0_75] : memref<6x4x1x32xf32, #tpu.memory_space<vmem>>, vector<1x1x1x32xf32>
    %69 = vector.shape_cast %68 : vector<1x1x1x32xf32> to vector<1x32xf32>
    %70 = vector.broadcast %69 : vector<1x32xf32> to vector<8x32xf32>
    %71 = arith.mulf %30, %70 : vector<8x32xf32>
    %72 = arith.addf %67, %71 : vector<8x32xf32>
    %c1_76 = arith.constant 1 : index
    %c3_77 = arith.constant 3 : index
    %c0_78 = arith.constant 0 : index
    %c0_79 = arith.constant 0 : index
    %73 = vector.load %arg4[%c1_76, %c3_77, %c0_78, %c0_79] : memref<6x4x1x32xf32, #tpu.memory_space<vmem>>, vector<1x1x1x32xf32>
    %74 = vector.shape_cast %73 : vector<1x1x1x32xf32> to vector<1x32xf32>
    %75 = vector.broadcast %74 : vector<1x32xf32> to vector<8x32xf32>
    %76 = arith.mulf %32, %75 : vector<8x32xf32>
    %77 = arith.addf %72, %76 : vector<8x32xf32>
    %c0_80 = arith.constant 0 : index
    %c0_81 = arith.constant 0 : index
    %c0_82 = arith.constant 0 : index
    %78 = vector.load %arg5[%c0_80, %c0_81, %c0_82] : memref<3x1x1xf32, #tpu.memory_space<vmem>>, vector<1x1x1xf32>
    %79 = vector.shape_cast %78 : vector<1x1x1xf32> to vector<1x1xf32>
    %80 = vector.broadcast %79 : vector<1x1xf32> to vector<8x32xf32>
    %81 = arith.addf %77, %80 : vector<8x32xf32>
    %c0_83 = arith.constant 0 : index
    %c0_84 = arith.constant 0 : index
    %c0_85 = arith.constant 0 : index
    %c32 = arith.constant 32 : index
    %82 = vector.load %arg6[%c0_83, %c0_84, %c0_85, %c32] : memref<1x3x8x64xf32, #tpu.memory_space<vmem>>, vector<1x1x8x32xf32>
    %83 = vector.shape_cast %82 : vector<1x1x8x32xf32> to vector<8x32xf32>
    %84 = vector.shape_cast %81 : vector<8x32xf32> to vector<1x1x8x32xf32>
    tpu.vector_store %arg6[%c0_83, %c0_84, %c0_85, %c32], %84 {strides = array<i32>} : memref<1x3x8x64xf32, #tpu.memory_space<vmem>>, vector<1x1x8x32xf32>,
    %c2_86 = arith.constant 2 : index
    %c0_87 = arith.constant 0 : index
    %c0_88 = arith.constant 0 : index
    %c0_89 = arith.constant 0 : index
    %85 = vector.load %arg4[%c2_86, %c0_87, %c0_88, %c0_89] : memref<6x4x1x32xf32, #tpu.memory_space<vmem>>, vector<1x1x1x32xf32>
    %86 = vector.shape_cast %85 : vector<1x1x1x32xf32> to vector<1x32xf32>
    %87 = vector.broadcast %86 : vector<1x32xf32> to vector<8x32xf32>
    %88 = arith.mulf %26, %87 : vector<8x32xf32>
    %c2_90 = arith.constant 2 : index
    %c1_91 = arith.constant 1 : index
    %c0_92 = arith.constant 0 : index
    %c0_93 = arith.constant 0 : index
    %89 = vector.load %arg4[%c2_90, %c1_91, %c0_92, %c0_93] : memref<6x4x1x32xf32, #tpu.memory_space<vmem>>, vector<1x1x1x32xf32>
    %90 = vector.shape_cast %89 : vector<1x1x1x32xf32> to vector<1x32xf32>
    %91 = vector.broadcast %90 : vector<1x32xf32> to vector<8x32xf32>
    %92 = arith.mulf %28, %91 : vector<8x32xf32>
    %93 = arith.addf %88, %92 : vector<8x32xf32>
    %c2_94 = arith.constant 2 : index
    %c2_95 = arith.constant 2 : index
    %c0_96 = arith.constant 0 : index
    %c0_97 = arith.constant 0 : index
    %94 = vector.load %arg4[%c2_94, %c2_95, %c0_96, %c0_97] : memref<6x4x1x32xf32, #tpu.memory_space<vmem>>, vector<1x1x1x32xf32>
    %95 = vector.shape_cast %94 : vector<1x1x1x32xf32> to vector<1x32xf32>
    %96 = vector.broadcast %95 : vector<1x32xf32> to vector<8x32xf32>
    %97 = arith.mulf %30, %96 : vector<8x32xf32>
    %98 = arith.addf %93, %97 : vector<8x32xf32>
    %c2_98 = arith.constant 2 : index
    %c3_99 = arith.constant 3 : index
    %c0_100 = arith.constant 0 : index
    %c0_101 = arith.constant 0 : index
    %99 = vector.load %arg4[%c2_98, %c3_99, %c0_100, %c0_101] : memref<6x4x1x32xf32, #tpu.memory_space<vmem>>, vector<1x1x1x32xf32>
    %100 = vector.shape_cast %99 : vector<1x1x1x32xf32> to vector<1x32xf32>
    %101 = vector.broadcast %100 : vector<1x32xf32> to vector<8x32xf32>
    %102 = arith.mulf %32, %101 : vector<8x32xf32>
    %103 = arith.addf %98, %102 : vector<8x32xf32>
    %c1_102 = arith.constant 1 : index
    %c0_103 = arith.constant 0 : index
    %c0_104 = arith.constant 0 : index
    %104 = vector.load %arg5[%c1_102, %c0_103, %c0_104] : memref<3x1x1xf32, #tpu.memory_space<vmem>>, vector<1x1x1xf32>
    %105 = vector.shape_cast %104 : vector<1x1x1xf32> to vector<1x1xf32>
    %106 = vector.broadcast %105 : vector<1x1xf32> to vector<8x32xf32>
    %107 = arith.addf %103, %106 : vector<8x32xf32>
    %c0_105 = arith.constant 0 : index
    %c1_106 = arith.constant 1 : index
    %c0_107 = arith.constant 0 : index
    %c0_108 = arith.constant 0 : index
    %108 = vector.load %arg6[%c0_105, %c1_106, %c0_107, %c0_108] : memref<1x3x8x64xf32, #tpu.memory_space<vmem>>, vector<1x1x8x32xf32>
    %109 = vector.shape_cast %108 : vector<1x1x8x32xf32> to vector<8x32xf32>
    %110 = vector.shape_cast %107 : vector<8x32xf32> to vector<1x1x8x32xf32>
    tpu.vector_store %arg6[%c0_105, %c1_106, %c0_107, %c0_108], %110 {strides = array<i32>} : memref<1x3x8x64xf32, #tpu.memory_space<vmem>>, vector<1x1x8x32xf32>,
    %c3_109 = arith.constant 3 : index
    %c0_110 = arith.constant 0 : index
    %c0_111 = arith.constant 0 : index
    %c0_112 = arith.constant 0 : index
    %111 = vector.load %arg4[%c3_109, %c0_110, %c0_111, %c0_112] : memref<6x4x1x32xf32, #tpu.memory_space<vmem>>, vector<1x1x1x32xf32>
    %112 = vector.shape_cast %111 : vector<1x1x1x32xf32> to vector<1x32xf32>
    %113 = vector.broadcast %112 : vector<1x32xf32> to vector<8x32xf32>
    %114 = arith.mulf %26, %113 : vector<8x32xf32>
    %c3_113 = arith.constant 3 : index
    %c1_114 = arith.constant 1 : index
    %c0_115 = arith.constant 0 : index
    %c0_116 = arith.constant 0 : index
    %115 = vector.load %arg4[%c3_113, %c1_114, %c0_115, %c0_116] : memref<6x4x1x32xf32, #tpu.memory_space<vmem>>, vector<1x1x1x32xf32>
    %116 = vector.shape_cast %115 : vector<1x1x1x32xf32> to vector<1x32xf32>
    %117 = vector.broadcast %116 : vector<1x32xf32> to vector<8x32xf32>
    %118 = arith.mulf %28, %117 : vector<8x32xf32>
    %119 = arith.addf %114, %118 : vector<8x32xf32>
    %c3_117 = arith.constant 3 : index
    %c2_118 = arith.constant 2 : index
    %c0_119 = arith.constant 0 : index
    %c0_120 = arith.constant 0 : index
    %120 = vector.load %arg4[%c3_117, %c2_118, %c0_119, %c0_120] : memref<6x4x1x32xf32, #tpu.memory_space<vmem>>, vector<1x1x1x32xf32>
    %121 = vector.shape_cast %120 : vector<1x1x1x32xf32> to vector<1x32xf32>
    %122 = vector.broadcast %121 : vector<1x32xf32> to vector<8x32xf32>
    %123 = arith.mulf %30, %122 : vector<8x32xf32>
    %124 = arith.addf %119, %123 : vector<8x32xf32>
    %c3_121 = arith.constant 3 : index
    %c3_122 = arith.constant 3 : index
    %c0_123 = arith.constant 0 : index
    %c0_124 = arith.constant 0 : index
    %125 = vector.load %arg4[%c3_121, %c3_122, %c0_123, %c0_124] : memref<6x4x1x32xf32, #tpu.memory_space<vmem>>, vector<1x1x1x32xf32>
    %126 = vector.shape_cast %125 : vector<1x1x1x32xf32> to vector<1x32xf32>
    %127 = vector.broadcast %126 : vector<1x32xf32> to vector<8x32xf32>
    %128 = arith.mulf %32, %127 : vector<8x32xf32>
    %129 = arith.addf %124, %128 : vector<8x32xf32>
    %c1_125 = arith.constant 1 : index
    %c0_126 = arith.constant 0 : index
    %c0_127 = arith.constant 0 : index
    %130 = vector.load %arg5[%c1_125, %c0_126, %c0_127] : memref<3x1x1xf32, #tpu.memory_space<vmem>>, vector<1x1x1xf32>
    %131 = vector.shape_cast %130 : vector<1x1x1xf32> to vector<1x1xf32>
    %132 = vector.broadcast %131 : vector<1x1xf32> to vector<8x32xf32>
    %133 = arith.addf %129, %132 : vector<8x32xf32>
    %c0_128 = arith.constant 0 : index
    %c1_129 = arith.constant 1 : index
    %c0_130 = arith.constant 0 : index
    %c32_131 = arith.constant 32 : index
    %134 = vector.load %arg6[%c0_128, %c1_129, %c0_130, %c32_131] : memref<1x3x8x64xf32, #tpu.memory_space<vmem>>, vector<1x1x8x32xf32>
    %135 = vector.shape_cast %134 : vector<1x1x8x32xf32> to vector<8x32xf32>
    %136 = vector.shape_cast %133 : vector<8x32xf32> to vector<1x1x8x32xf32>
    tpu.vector_store %arg6[%c0_128, %c1_129, %c0_130, %c32_131], %136 {strides = array<i32>} : memref<1x3x8x64xf32, #tpu.memory_space<vmem>>, vector<1x1x8x32xf32>,
    %c4 = arith.constant 4 : index
    %c0_132 = arith.constant 0 : index
    %c0_133 = arith.constant 0 : index
    %c0_134 = arith.constant 0 : index
    %137 = vector.load %arg4[%c4, %c0_132, %c0_133, %c0_134] : memref<6x4x1x32xf32, #tpu.memory_space<vmem>>, vector<1x1x1x32xf32>
    %138 = vector.shape_cast %137 : vector<1x1x1x32xf32> to vector<1x32xf32>
    %139 = vector.broadcast %138 : vector<1x32xf32> to vector<8x32xf32>
    %140 = arith.mulf %26, %139 : vector<8x32xf32>
    %c4_135 = arith.constant 4 : index
    %c1_136 = arith.constant 1 : index
    %c0_137 = arith.constant 0 : index
    %c0_138 = arith.constant 0 : index
    %141 = vector.load %arg4[%c4_135, %c1_136, %c0_137, %c0_138] : memref<6x4x1x32xf32, #tpu.memory_space<vmem>>, vector<1x1x1x32xf32>
    %142 = vector.shape_cast %141 : vector<1x1x1x32xf32> to vector<1x32xf32>
    %143 = vector.broadcast %142 : vector<1x32xf32> to vector<8x32xf32>
    %144 = arith.mulf %28, %143 : vector<8x32xf32>
    %145 = arith.addf %140, %144 : vector<8x32xf32>
    %c4_139 = arith.constant 4 : index
    %c2_140 = arith.constant 2 : index
    %c0_141 = arith.constant 0 : index
    %c0_142 = arith.constant 0 : index
    %146 = vector.load %arg4[%c4_139, %c2_140, %c0_141, %c0_142] : memref<6x4x1x32xf32, #tpu.memory_space<vmem>>, vector<1x1x1x32xf32>
    %147 = vector.shape_cast %146 : vector<1x1x1x32xf32> to vector<1x32xf32>
    %148 = vector.broadcast %147 : vector<1x32xf32> to vector<8x32xf32>
    %149 = arith.mulf %30, %148 : vector<8x32xf32>
    %150 = arith.addf %145, %149 : vector<8x32xf32>
    %c4_143 = arith.constant 4 : index
    %c3_144 = arith.constant 3 : index
    %c0_145 = arith.constant 0 : index
    %c0_146 = arith.constant 0 : index
    %151 = vector.load %arg4[%c4_143, %c3_144, %c0_145, %c0_146] : memref<6x4x1x32xf32, #tpu.memory_space<vmem>>, vector<1x1x1x32xf32>
    %152 = vector.shape_cast %151 : vector<1x1x1x32xf32> to vector<1x32xf32>
    %153 = vector.broadcast %152 : vector<1x32xf32> to vector<8x32xf32>
    %154 = arith.mulf %32, %153 : vector<8x32xf32>
    %155 = arith.addf %150, %154 : vector<8x32xf32>
    %c2_147 = arith.constant 2 : index
    %c0_148 = arith.constant 0 : index
    %c0_149 = arith.constant 0 : index
    %156 = vector.load %arg5[%c2_147, %c0_148, %c0_149] : memref<3x1x1xf32, #tpu.memory_space<vmem>>, vector<1x1x1xf32>
    %157 = vector.shape_cast %156 : vector<1x1x1xf32> to vector<1x1xf32>
    %158 = vector.broadcast %157 : vector<1x1xf32> to vector<8x32xf32>
    %159 = arith.addf %155, %158 : vector<8x32xf32>
    %c0_150 = arith.constant 0 : index
    %c2_151 = arith.constant 2 : index
    %c0_152 = arith.constant 0 : index
    %c0_153 = arith.constant 0 : index
    %160 = vector.load %arg6[%c0_150, %c2_151, %c0_152, %c0_153] : memref<1x3x8x64xf32, #tpu.memory_space<vmem>>, vector<1x1x8x32xf32>
    %161 = vector.shape_cast %160 : vector<1x1x8x32xf32> to vector<8x32xf32>
    %162 = vector.shape_cast %159 : vector<8x32xf32> to vector<1x1x8x32xf32>
    tpu.vector_store %arg6[%c0_150, %c2_151, %c0_152, %c0_153], %162 {strides = array<i32>} : memref<1x3x8x64xf32, #tpu.memory_space<vmem>>, vector<1x1x8x32xf32>,
    %c5 = arith.constant 5 : index
    %c0_154 = arith.constant 0 : index
    %c0_155 = arith.constant 0 : index
    %c0_156 = arith.constant 0 : index
    %163 = vector.load %arg4[%c5, %c0_154, %c0_155, %c0_156] : memref<6x4x1x32xf32, #tpu.memory_space<vmem>>, vector<1x1x1x32xf32>
    %164 = vector.shape_cast %163 : vector<1x1x1x32xf32> to vector<1x32xf32>
    %165 = vector.broadcast %164 : vector<1x32xf32> to vector<8x32xf32>
    %166 = arith.mulf %26, %165 : vector<8x32xf32>
    %c5_157 = arith.constant 5 : index
    %c1_158 = arith.constant 1 : index
    %c0_159 = arith.constant 0 : index
    %c0_160 = arith.constant 0 : index
    %167 = vector.load %arg4[%c5_157, %c1_158, %c0_159, %c0_160] : memref<6x4x1x32xf32, #tpu.memory_space<vmem>>, vector<1x1x1x32xf32>
    %168 = vector.shape_cast %167 : vector<1x1x1x32xf32> to vector<1x32xf32>
    %169 = vector.broadcast %168 : vector<1x32xf32> to vector<8x32xf32>
    %170 = arith.mulf %28, %169 : vector<8x32xf32>
    %171 = arith.addf %166, %170 : vector<8x32xf32>
    %c5_161 = arith.constant 5 : index
    %c2_162 = arith.constant 2 : index
    %c0_163 = arith.constant 0 : index
    %c0_164 = arith.constant 0 : index
    %172 = vector.load %arg4[%c5_161, %c2_162, %c0_163, %c0_164] : memref<6x4x1x32xf32, #tpu.memory_space<vmem>>, vector<1x1x1x32xf32>
    %173 = vector.shape_cast %172 : vector<1x1x1x32xf32> to vector<1x32xf32>
    %174 = vector.broadcast %173 : vector<1x32xf32> to vector<8x32xf32>
    %175 = arith.mulf %30, %174 : vector<8x32xf32>
    %176 = arith.addf %171, %175 : vector<8x32xf32>
    %c5_165 = arith.constant 5 : index
    %c3_166 = arith.constant 3 : index
    %c0_167 = arith.constant 0 : index
    %c0_168 = arith.constant 0 : index
    %177 = vector.load %arg4[%c5_165, %c3_166, %c0_167, %c0_168] : memref<6x4x1x32xf32, #tpu.memory_space<vmem>>, vector<1x1x1x32xf32>
    %178 = vector.shape_cast %177 : vector<1x1x1x32xf32> to vector<1x32xf32>
    %179 = vector.broadcast %178 : vector<1x32xf32> to vector<8x32xf32>
    %180 = arith.mulf %32, %179 : vector<8x32xf32>
    %181 = arith.addf %176, %180 : vector<8x32xf32>
    %c2_169 = arith.constant 2 : index
    %c0_170 = arith.constant 0 : index
    %c0_171 = arith.constant 0 : index
    %182 = vector.load %arg5[%c2_169, %c0_170, %c0_171] : memref<3x1x1xf32, #tpu.memory_space<vmem>>, vector<1x1x1xf32>
    %183 = vector.shape_cast %182 : vector<1x1x1xf32> to vector<1x1xf32>
    %184 = vector.broadcast %183 : vector<1x1xf32> to vector<8x32xf32>
    %185 = arith.addf %181, %184 : vector<8x32xf32>
    %c0_172 = arith.constant 0 : index
    %c2_173 = arith.constant 2 : index
    %c0_174 = arith.constant 0 : index
    %c32_175 = arith.constant 32 : index
    %186 = vector.load %arg6[%c0_172, %c2_173, %c0_174, %c32_175] : memref<1x3x8x64xf32, #tpu.memory_space<vmem>>, vector<1x1x8x32xf32>
    %187 = vector.shape_cast %186 : vector<1x1x8x32xf32> to vector<8x32xf32>
    %188 = vector.shape_cast %185 : vector<8x32xf32> to vector<1x1x8x32xf32>
    tpu.vector_store %arg6[%c0_172, %c2_173, %c0_174, %c32_175], %188 {strides = array<i32>} : memref<1x3x8x64xf32, #tpu.memory_space<vmem>>, vector<1x1x8x32xf32>,
    return
  }
  func.func @transform_0(%arg0: i32, %arg1: i32) -> (i32, i32, i32, i32) {
    %c0_i32 = arith.constant 0 : i32
    %c0_i32_0 = arith.constant 0 : i32
    %c0_i32_1 = arith.constant 0 : i32
    return %arg0, %c0_i32, %arg1, %c0_i32_0 : i32, i32, i32, i32
  }
  func.func @transform_1(%arg0: i32, %arg1: i32) -> (i32, i32) {
    %c0_i32 = arith.constant 0 : i32
    %c0_i32_0 = arith.constant 0 : i32
    %c0_i32_1 = arith.constant 0 : i32
    return %c0_i32, %c0_i32_0 : i32, i32
  }
  func.func @transform_2(%arg0: i32, %arg1: i32) -> (i32, i32, i32, i32) {
    %c0_i32 = arith.constant 0 : i32
    %c0_i32_0 = arith.constant 0 : i32
    %c0_i32_1 = arith.constant 0 : i32
    %c0_i32_2 = arith.constant 0 : i32
    %c0_i32_3 = arith.constant 0 : i32
    return %c0_i32, %c0_i32_0, %c0_i32_1, %c0_i32_2 : i32, i32, i32, i32
  }
  func.func @transform_3(%arg0: i32, %arg1: i32) -> (i32, i32, i32) {
    %c0_i32 = arith.constant 0 : i32
    %c0_i32_0 = arith.constant 0 : i32
    %c0_i32_1 = arith.constant 0 : i32
    %c0_i32_2 = arith.constant 0 : i32
    return %c0_i32, %c0_i32_0, %c0_i32_1 : i32, i32, i32
  }
  func.func @transform_4(%arg0: i32, %arg1: i32) -> (i32, i32, i32, i32) {
    %c0_i32 = arith.constant 0 : i32
    %c0_i32_0 = arith.constant 0 : i32
    %c0_i32_1 = arith.constant 0 : i32
    return %arg0, %c0_i32, %arg1, %c0_i32_0 : i32, i32, i32, i32
  }
}

</mosaic_0001>

<bundles_post_ra>
// kernel: tpu_custom_call.1
= control target key start
LH: loop header
LB: loop body
LE: loop exit
PB: predicated region body
PF: predicated region fallthrough
CT: control target
= control target key end

     0   :  { %s3778_s0 = inlined_call_operand.hbm [shape: f32[2,4,16,16], index: 0, kind: input, shape index: {}]   ;;  %s3779_s1 = inlined_call_operand.hbm [shape: f32[16,32], index: 1, kind: input, shape index: {}]   ;;  %s3780_s2 = inlined_call_operand.hbm [shape: f32[6,4,1,32], index: 2, kind: input, shape index: {}]   ;;  %s3781_s3 = inlined_call_operand.vmem [shape: f32[3,1,1], index: 3, kind: input, shape index: {}]   ;;  %s3782_s4 = inlined_call_operand.hbm [shape: f32[2,3,16,64], index: 4, kind: output, shape index: {}]  }
   0x1   :  { %3791 = sst [smem:[#allocation15_spill]] %s3779_s1 }
   0x2   :  { %9 = vsyncpa [#allocation4], 0 }
   0x3   :  { %11 = vsyncpa [#allocation4 + $0x1], 0 }
   0x4   :  { %12 = vsyncpa [#allocation7], 0 }
   0x5   :  { %13 = vsyncpa [#allocation5], 0 }
   0x6   :  { %15 = vsyncpa [#allocation5 + $0x1], 0  ;;  %s3333_s15 = smov 0   ;;  %s3335_s16 = smov 0  }
   0x7   :  { %s3337_s17 = smov 0   ;;  %s3339_s18 = smov 0  }
   0x8   :  { %s3341_s19 = smov 0   ;;  %s3343_s20 = smov 0  }
   0x9   :  { %s3345_s21 = smov 0   ;;  %s3347_s22 = smov 0  }
   0xa LB: > { %3792 = sst [smem:[#allocation13_spill]] %s3261_s15  ;;  %s2576_s23 = sadd.s32 4294967295, %s3289_s22   ;;  %s3289_s22 = sphi %s3347_s22, %s21_s22   ;;  %s3285_s21 = sphi %s3345_s21, %s3819_s21   ;;  %s3281_s20 = sphi %s3343_s20, %s3818_s20   ;;  %s3277_s19 = sphi %s3341_s19, %s3817_s19   ;;  %s3273_s18 = sphi %s3339_s18, %s3816_s18   ;;  %s3269_s17 = sphi %s3337_s17, %s3815_s17   ;;  %s3265_s16 = sphi %s3335_s16, %s3814_s16   ;;  %s3261_s15 = sphi %s3333_s15, %s3813_s15  }
   0xb   : > { %s2577_s24 = sadd.s32 4294967294, %s3289_s22   ;;  %p49_p0 = scmp.ne.s32.totalorder %s3269_s17, %s3265_s16 }
   0xc   : > { %p50_p1 = scmp.eq.s32.totalorder %s3289_s22, 0  ;;  %p55_p2 = scmp.ne.s32.totalorder %s3265_s16, %s3261_s15 }
   0xd   : > { %p3381_p3 = scmp.eq.s32.totalorder %s2576_s23, 0  ;;  %p144_p4 = scmp.eq.s32.totalorder %s2576_s23, 3 }
   0xe   : > { %p3385_p5 = por %p50_p1, %p49_p0  ;;  %p150_p6 = scmp.eq.s32.totalorder %s2577_s24, 3 }
   0xf   : > { %s3793_s26 = scalar_select %p3381_p3, 1, 0 }
  0x10   : > { %p3391_p7 = por %p3381_p3, %p55_p2  ;;  %p3395_p8 = por %p144_p4, %p49_p0 }
  0x11   : > { %p3399_p9 = por %p150_p6, %p55_p2  ;;  %p2578_p10 = scmp.ge.s32.totalorder %s3289_s22, 1 }
  0x12   : > { %s3795_s28 = scalar_select %p3391_p7, 1, 0 }
  0x13   : > { %s3796_s29 = scalar_select %p3395_p8, 1, 0 }
  0x14   : > { %s3797_s30 = scalar_select %p3399_p9, 1, 0 }
  0x15   : > { %p157_p11 = scmp.lt.s32.totalorder %s3289_s22, 5  ;;  %s3291_s6 = smov [#allocation6]  }
  0x16   : > { %3798 = sst [smem:[#allocation14_spill]] %s3797_s30  ;;  %s169_s7 = sshll.u32 %s3291_s6, 4  ;;  %s3409_s7 = int_to_ptr.vmem [resolvable:$true] %s169_s7 }
  0x17   : > { %p3405_p12 = pnand %p2578_p10, %p157_p11  ;;  %p3016_p0 = scmp.lt.s32.totalorder %s3289_s22, 4 }
  0x18   : > { %s3292_s9 = smov [#allocation8]   ;;  %s3802_s1 = sld [smem:[#allocation15_spill]] }
  0x19   : > { %p2999_p13 = pneg %p3405_p12  ;;  %s182_s10 = sshll.u32 %s3292_s9, 4  ;;  %s3426_s10 = int_to_ptr.vmem [resolvable:$true] %s182_s10 }
  0x1a   : > { %p3422_p2 = pnand %p3016_p0, %p3385_p5 }
  0x1b   : > { %p3416_p1 = pnand %p2999_p13, %p3381_p3 }
  0x1d   : > { %p3103_p6 = pneg %p3416_p1 }
  0x1e   : > { %s3101_s14 = scalar_lea.hbm %s3802_s1, 256 }
  0x1f   : > { %p3102_p4 = scmp.ne.s32.totalorder %s3802_s1, %s3101_s14  ;;  %p3108_p5 = scmp.lt.u32.totalorder %s3101_s14, %s3802_s1 }
  0x21   : > { %p3104_p10 = pnand %p3103_p6, %p3102_p4 }
  0x23   : > { %p3105_p11 = pneg %p3104_p10 }
  0x25   : > { %p3110_p13 = pnand %p3108_p5, %p3105_p11 }
  0x27   : > { %3113 = shalt.err (!%p3110_p13)
}
  0x28   : > { %s3114_s9 = scalar_lea.vmem %s3409_s7, 256  ;;  %p3122_p3 = scmp.lt.s32.totalorder %s3409_s7, %s3409_s7 }
  0x29   : > { %p3115_p0 = scmp.ne.s32.totalorder %s3409_s7, %s3114_s9  ;;  %p3123_p4 = scmp.lt.s32.totalorder %s3114_s9, %s3114_s9 }
  0x2b   : > { %p3117_p9 = pnand %p3115_p0, %p3103_p6  ;;  %p3124_p10 = por %p3123_p4, %p3122_p3 }
  0x2d   : > { %p3118_p8 = pneg %p3117_p9 }
  0x2f   : > { %p3125_p7 = pnand %p3124_p10, %p3118_p8 }
  0x31   : > { %3128 = shalt.err (!%p3125_p7)
}
  0x32   : > { %s3789_s12 = smov 128   ;;  %s3790_s13 = smov 8  }
  0x33   : > { %3002 = dma.hbm_to_vmem [thread:$0]  (!%p3416_p1), %s3802_s1, 256, %s3409_s7, [#allocation7], %s3789_s12, %s3789_s12, %s3790_s13  }
  0x34   : > { %s3129_s6 = scalar_lea.hbm %s3780_s2, 384 }
  0x35   : > { %p3130_p3 = scmp.ne.s32.totalorder %s3780_s2, %s3129_s6  ;;  %p3136_p9 = scmp.lt.u32.totalorder %s3129_s6, %s3780_s2 }
  0x37   : > { %p3132_p7 = pnand %p3130_p3, %p3103_p6 }
  0x39   : > { %p3133_p8 = pneg %p3132_p7 }
  0x3b   : > { %p3138_p11 = pnand %p3136_p9, %p3133_p8 }
  0x3d   : > { %3141 = shalt.err (!%p3138_p11)
}
  0x3e   : > { %s3142_s7 = scalar_lea.vmem %s3426_s10, 384  ;;  %p3150_p4 = scmp.lt.s32.totalorder %s3426_s10, %s3426_s10 }
  0x3f   : > { %p3143_p5 = scmp.ne.s32.totalorder %s3426_s10, %s3142_s7  ;;  %p3151_p10 = scmp.lt.s32.totalorder %s3142_s7, %s3142_s7 }
  0x41   : > { %p3145_p13 = pnand %p3143_p5, %p3103_p6  ;;  %p3152_p3 = por %p3151_p10, %p3150_p4 }
  0x43   : > { %p3146_p0 = pneg %p3145_p13 }
  0x45   : > { %p3153_p7 = pnand %p3152_p3, %p3146_p0 }
  0x47   : > { %3156 = shalt.err (!%p3153_p7)
}
  0x48   : > { %s3295_s15 = smov 16   ;;  %s3296_s25 = smov 1  }
  0x49   : > { %3005 = dma.hbm_to_vmem [thread:$0]  (!%p3416_p1), %s3780_s2, 384, %s3426_s10, [#allocation7], %s3295_s15, %s3295_s15, %s3296_s25  }
  0x4a   : > { %s30_s23 = sadd.s32 1, %s3281_s20  ;;  %s33_s24 = sadd.s32 1, %s3285_s21 }
  0x4b   : > { %p31_p6 = scmp.ge.s32.totalorder %s30_s23, 2  ;;  %s199_s27 = sand.u32 1, %s3269_s17  }
  0x4c   : > { %s2582_s6 = sshll.u32 %s199_s27, 5  ;;  %s2583_s7 = sshll.u32 %s3285_s21, 3 }
  0x4d   : > { %s3821_s23 = smov (%p31_p6, %s30_s23), 0  ;;  %s3823_s24 = smov (!%p31_p6, %s33_s24), %s3285_s21 }
  0x4e   : > { %s38_s9 = ssub.s32 %s3281_s20, %s3821_s23  ;;  %p35_p8 = scmp.ge.s32.totalorder %s3823_s24, 2 }
  0x4f   : > { %s208_s8 = sadd.s32 %s3281_s20, %s2583_s7  ;;  %s203_s12 = scalar_lea.vmem [#allocation3], %s2582_s6 }
  0x50   : > { %s211_s13 = sshll.u32 %s203_s12, 4  ;;  %s3825_s24 = smov (%p35_p8, %s3823_s24), 0  ;;  %s3495_s13 = int_to_ptr.vmem [resolvable:$true] %s211_s13 }
  0x51   : > { %s2584_s10 = sshll.u32 %s208_s8, 7  ;;  %s37_s15 = ssub.s32 %s3285_s21, %s3825_s24 }
  0x52   : > { %s3502_s14 = scalar_lea.hbm %s3778_s0, %s2584_s10  ;;  %s3504_s1 = sor.u32 %s38_s9, %s37_s15 }
  0x53   : > { %s3507_s12 = scalar_lea.sflag [#allocation4], %s199_s27  ;;  %s3157_s6 = scalar_lea.hbm %s3502_s14, 512 }
  0x54   : > { %p3158_p9 = scmp.ne.s32.totalorder %s3502_s14, %s3157_s6  ;;  %p3159_p11 = pneg %p3422_p2 }
  0x55   : > { %s3162_s10 = scalar_lea.hbm %s3778_s0, 2048  ;;  %p3163_p0 = scmp.lt.u32.totalorder %s3502_s14, %s3778_s0 }
  0x56   : > { %p3160_p5 = pnand %p3159_p11, %p3158_p9  ;;  %p3164_p4 = scmp.lt.u32.totalorder %s3162_s10, %s3157_s6 }
  0x57   : > { %p3166_p3 = scmp.lt.u32.totalorder %s3157_s6, %s3502_s14 }
  0x58   : > { %p3161_p13 = pneg %p3160_p5  ;;  %p3165_p10 = por %p3164_p4, %p3163_p0 }
  0x5a   : > { %p3167_p7 = por %p3166_p3, %p3165_p10 }
  0x5c   : > { %p3168_p6 = pnand %p3167_p7, %p3161_p13 }
  0x5e   : > { %3171 = shalt.err (!%p3168_p6)
}
  0x5f   : > { %s3172_s27 = scalar_lea.vmem %s3495_s13, 512  ;;  %s3297_s9 = smov [#allocation3]  }
  0x60   : > { %p3173_p8 = scmp.ne.s32.totalorder %s3495_s13, %s3172_s27  ;;  %s3177_s15 = sshll.u32 %s3297_s9, 4  ;;  %s3178_s15 = int_to_ptr.vmem [resolvable:$false] %s3177_s15 }
  0x61   : > { %s3179_s7 = scalar_lea.vmem %s3178_s15, 1024  ;;  %p3180_p1 = scmp.lt.s32.totalorder %s3495_s13, %s3178_s15 }
  0x62   : > { %p3175_p9 = pnand %p3173_p8, %p3159_p11  ;;  %p3181_p0 = scmp.lt.s32.totalorder %s3179_s7, %s3172_s27 }
  0x64   : > { %p3176_p5 = pneg %p3175_p9  ;;  %p3182_p4 = por %p3181_p0, %p3180_p1 }
  0x66   : > { %p3183_p10 = pnand %p3182_p4, %p3176_p5 }
  0x68   : > { %3186 = shalt.err (!%p3183_p10)
}
  0x69   : > { %s3298_s6 = smov 256   ;;  %s3803_s8 = smov 8  }
  0x6a   : > { %s3804_s10 = smov 128   ;;  %s3805_s25 = sadd.s32 1, %s3269_s17 }
  0x6b   : > { %3009 = dma.hbm_to_vmem [thread:$0]  (!%p3422_p2), %s3502_s14, 512, %s3495_s13, %s3507_s12, %s3298_s6, %s3804_s10, %s3803_s8  }
  0x6c   : > { %p3806_p11 = scmp.eq.s32.totalorder %s3504_s1, 0  ;;  %223 = sbr.rel (%p3405_p12) target bundleno = 580 (0x244), region = 36 }
  0x6d   : > { %s3547_s27 = sand.u32 (!%p3405_p12), 1, %s3265_s16   ;;  %p3807_p1 = scmp.ne.s32.totalorder (!%p3405_p12), %s3795_s28, 0 }
  0x6e   : > { %s3542_s30 = scalar_select %p3806_p11, %s3269_s17, %s3805_s25  }
  0x6f   : > { %s2586_s11 = sshll.u32 (!%p3405_p12), %s3547_s27, 5  ;;  %s226_s9 = scalar_lea.sflag (!%p3405_p12), [#allocation4], %s3547_s27 }
  0x70   : > { %s3551_s15 = scalar_lea.vmem (!%p3405_p12), [#allocation3], %s2586_s11 }
  0x73   : > { %3248 = dma.done.wait (%p3807_p1), %s226_s9, 512  }
  0x74   : > { %3250 = vsyncadd (%p3807_p1), %s226_s9, 4294966784  ;;  %p3808_p2 = scmp.ne.s32.totalorder %s3793_s26, 0 }
  0x76   : > { %3252 = dma.done.wait (%p3808_p2), [#allocation7], 640  }
  0x77   : > { %3254 = vsyncadd (%p3808_p2), [#allocation7], 4294966656  ;;  %v3299_v0 = vmov 0.0|0.0   ;;  %vm3300_vm0 = vmmov 0   ;;  %v3301_v1 = vmov 0.0   ;;  %v3302_v2 = vmov 0  }
  0x78   : > { %2873 = vmatprep.subr.bf16.mxu0 %v3299_v0  ;;  %2891 = vmatprep.subr.bf16.mxu1 %v3299_v0  ;;  %vm265_vm1 = vcmask 130048   ;;  %v262_v3 = vld [vmem:[#allocation6] sm:$0xff]  ;;  %v263_v4 = vld [vmem:[#allocation6 + $0x8] sm:$0xff]  ;;  %v2590_v35 = vld [vmem:[%s3551_s15 + $0x10] sm:$0xff]  ;;  %vm728_vm2 = vcmask 261120   ;;  %s2985_s12 = smul.u32 24, %s3547_s27 }
  0x79   : > { %2709 = vmatprep.mubr.msk.f32.mxu0 %vm3300_vm0, %v3301_v1  ;;  %2751 = vmatprep.mubr.msk.f32.mxu1 %vm3300_vm0, %v3301_v1  ;;  %v264_v5 = vld [vmem:[%s3551_s15] sm:$0xff]  ;;  %v270_v6 = vand.u32 4294901760, %v262_v3  ;;  %v273_v7 = vand.u32 4294901760, %v263_v4  ;;  %v2589_v9 = vld [vmem:[%s3551_s15 + $0x8] sm:$0xff]  ;;  %v2591_v36 = vld [vmem:[%s3551_s15 + $0x18] sm:$0xff]  ;;  %v1199_v38 = vsel %vm265_vm1, %v2590_v35, 0 }
  0x7a   : > { %3100 = vset.pattern.permute.xlu1 %v3302_v2  ;;  %3099 = vset.pattern.permute.xlu0 %v3302_v2  ;;  %v267_v8 = vsel %vm265_vm1, %v264_v5, 0  ;;  %v733_v11 = vsel %vm265_vm1, %v2589_v9, 0  ;;  %v2628_v12 = vld [vmem:[%s3781_s3 + $0x2] ss:$0 sm:$0xff]  ;;  %v2601_v17 = vld [vmem:[%s3781_s3] ss:$0 sm:$0xff] }
  0x7b   : > { %v3570_v10 = vand.u32 4294901760, %v267_v8  ;;  %v3576_v13 = vpack.c.bf16 %v273_v7, %v270_v6  ;;  %v3578_v14 = vand.u32 4294901760, %v733_v11  ;;  %v348_v15 = vsub.f32 %v262_v3, %v270_v6  ;;  %2445 = vperm.xlu1 %3100, %v2628_v12   ;;  %2228 = vperm.xlu0 %3099, %v2601_v17   ;;  %v2614_v22 = vld [vmem:[%s3781_s3 + $0x1] ss:$0 sm:$0xff]  ;;  %v2623_v54 = vld [vmem:[#allocation8 + $0x14] ss:$0 sm:$0xff] }
  0x7c   : > { %v355_v16 = vsub.f32 %v263_v4, %v273_v7  ;;  %v1665_v39 = vsel %vm265_vm1, %v2591_v36, 0  ;;  %v3628_v40 = vand.u32 4294901760, %v1199_v38  ;;  %v2624_v55 = vld [vmem:[#allocation8 + $0x15] ss:$0 sm:$0xff]  ;;  %v2597_v56 = vld [vmem:[#allocation8 + $0x4] ss:$0 sm:$0xff] }
  0x7d   : > { %v337_v18 = vsub.f32 %v267_v8, %v3570_v10  ;;  %2875 = vmatpush3.bf16.msra.mxu0 %v3576_v13  ;;  %2893 = vmatpush3.bf16.msra.mxu1 %v3576_v13  ;;  %v803_v19 = vsub.f32 %v733_v11, %v3578_v14  ;;  %v349_v20 = vand.u32 4294901760, %v348_v15  ;;  %v3631_v41 = vand.u32 4294901760, %v1665_v39  ;;  %v2598_v57 = vld [vmem:[#allocation8 + $0x5] ss:$0 sm:$0xff]  ;;  %v2609_v58 = vld [vmem:[#allocation8 + $0xc] ss:$0 sm:$0xff] }
  0x7e   : > { %v356_v21 = vand.u32 4294901760, %v355_v16  ;;  %2876 = vmatprep.subr.bf16.mxu0 %v3299_v0  ;;  %2894 = vmatprep.subr.bf16.mxu1 %v3299_v0  ;;  %v3602_v34 = vpack.c.bf16 %v355_v16, %v348_v15  ;;  %v1269_v42 = vsub.f32 %v1199_v38, %v3628_v40  ;;  %v2610_v61 = vld [vmem:[#allocation8 + $0xd] ss:$0 sm:$0xff]  ;;  %v2592_v62 = vld [vmem:[#allocation8] ss:$0 sm:$0xff]  ;;  %s261_s7 = scalar_lea.vmem [#allocation9], %s2985_s12 }
  0x7f   : > { %v338_v23 = vand.u32 4294901760, %v337_v18  ;;  %v804_v24 = vand.u32 4294901760, %v803_v19  ;;  %v350_v25 = vsub.f32 %v348_v15, %v349_v20  ;;  %2177 = vperm.xlu1 %3100, %v2601_v17   ;;  %2337 = vperm.xlu0 %3099, %v2614_v22   ;;  %v1735_v43 = vsub.f32 %v1665_v39, %v3631_v41  ;;  %v2593_v2 = vld [vmem:[#allocation8 + $0x1] ss:$0 sm:$0xff]  ;;  %v2603_v15 = vld [vmem:[#allocation8 + $0x9] ss:$0 sm:$0xff] }
  0x80   : > { %v357_v26 = vsub.f32 %v355_v16, %v356_v21  ;;  %v3624_v37 = vpack.c.bf16 %v356_v21, %v349_v20  ;;  %v1270_v44 = vand.u32 4294901760, %v1269_v42  ;;  %v2616_v16 = vld [vmem:[#allocation8 + $0x10] ss:$0 sm:$0xff]  ;;  %v2617_v17 = vld [vmem:[#allocation8 + $0x11] ss:$0 sm:$0xff]  ;;  %s3303_s6 = smov 32  }
  0x81   : > { %v339_v27 = vsub.f32 %v337_v18, %v338_v23  ;;  %v805_v28 = vsub.f32 %v803_v19, %v804_v24  ;;  %v351_v29 = vand.u32 4294901760, %v350_v25  ;;  %v1736_v45 = vand.u32 4294901760, %v1735_v43  ;;  %v2611_v20 = vld [vmem:[#allocation8 + $0xe] ss:$0 sm:$0xff]  ;;  %v2594_v21 = vld [vmem:[#allocation8 + $0x2] ss:$0 sm:$0xff] }
  0x82   : > { %v358_v30 = vand.u32 4294901760, %v357_v26  ;;  %v1271_v46 = vsub.f32 %v1269_v42, %v1270_v44  ;;  %s2986_s8 = smul.u32 6, %s3277_s19  ;;  %vm2236_vm3 = vcmask 523520   ;;  %s2469_s25 = sshll.u32 %s261_s7, 4  ;;  %s3719_s25 = int_to_ptr.vmem [resolvable:$true] %s2469_s25 }
  0x83   : > { %v340_v31 = vand.u32 4294901760, %v339_v27  ;;  %v806_v32 = vand.u32 4294901760, %v805_v28  ;;  %2393 = vperm.xlu1 %3100, %v2628_v12   ;;  %2285 = vperm.xlu0 %3099, %v2614_v22   ;;  %v1737_v47 = vsub.f32 %v1735_v43, %v1736_v45  ;;  %v2600_v22 = vld [vmem:[#allocation8 + $0x7] ss:$0 sm:$0xff]  ;;  %s3187_s19 = scalar_lea.vmem %s3719_s25, 384  ;;  %p3809_p13 = scmp.ne.s32.totalorder %s3796_s29, 0 }
  0x84   : > { %v3592_v33 = vpack.c.bf16 %v358_v30, %v351_v29  ;;  %v1272_v48 = vand.u32 4294901760, %v1271_v46  ;;  %s2466_s10 = sadd.s32 %s3273_s18, %s2986_s8  ;;  %s2455_s18 = scalar_lea.sflag [#allocation5], %s3547_s27 }
  0x85   : > { %2710 = vmatmul.mubr.f32.vlgmr.msra.gmra.mrb[0].mxu0 %v340_v31  ;;  %2752 = vmatmul.mubr.f32.vlgmr.msra.gmra.mrb[0].mxu1 %v806_v32  ;;  %v1738_v49 = vand.u32 4294901760, %v1737_v47  ;;  %s2630_s11 = sshll.u32 %s2466_s10, 7  ;;  %p3188_p12 = scmp.ne.s32.totalorder %s3719_s25, %s3187_s19 }
  0x86   : > { %2878 = vmatpush3.bf16.msra.mxu0 %v3592_v33  ;;  %2896 = vmatpush3.bf16.msra.mxu1 %v3592_v33  ;;  %s3724_s1 = scalar_lea.hbm %s3782_s4, %s2630_s11  ;;  %s3304_s26 = smov [#allocation9]  }
  0x87   : > { %2716 = vmatprep.mubr.msk.f32.mxu0 %vm3300_vm0, %v3301_v1  ;;  %2758 = vmatprep.mubr.msk.f32.mxu1 %vm3300_vm0, %v3301_v1  ;;  %p3189_p3 = pnand %p3188_p12, %p3809_p13  ;;  %s3191_s28 = sshll.u32 %s3304_s26, 4  ;;  %s3192_s28 = int_to_ptr.vmem [resolvable:$false] %s3191_s28 }
  0x88   : > { %2879 = vmatprep.subr.bf16.mxu0 %v3299_v0  ;;  %2897 = vmatprep.subr.bf16.mxu1 %v3299_v0  ;;  %s3193_s5 = scalar_lea.vmem %s3192_s28, 768  ;;  %p3194_p6 = scmp.lt.s32.totalorder %s3719_s25, %s3192_s28 }
  0x89   : > { %p3190_p7 = pneg %p3189_p3  ;;  %p3195_p8 = scmp.lt.s32.totalorder %s3193_s5, %s3187_s19 }
  0x8b   : > { %p3196_p9 = por %p3195_p8, %p3194_p6 }
  0x8d   : > { %2717 = vmatmul.mubr.f32.vlgmr.msra.gmra.mrb[0].mxu0 %v3570_v10  ;;  %2759 = vmatmul.mubr.f32.vlgmr.msra.gmra.mrb[0].mxu1 %v3578_v14  ;;  %p3197_p5 = pnand %p3196_p9, %p3190_p7 }
  0x8e   : > { %2881 = vmatpush3.bf16.msra.mxu0 %v3602_v34  ;;  %2899 = vmatpush3.bf16.msra.mxu1 %v3602_v34 }
  0x8f   : > { %2723 = vmatprep.mubr.msk.f32.mxu0 %vm3300_vm0, %v3301_v1  ;;  %2765 = vmatprep.mubr.msk.f32.mxu1 %vm3300_vm0, %v3301_v1 }
  0x90   : > { %2882 = vmatprep.subr.bf16.mxu0 %v3299_v0  ;;  %2900 = vmatprep.subr.bf16.mxu1 %v3299_v0 }
  0x95   : > { %2724 = vmatmul.mubr.f32.vlgmr.msra.gmra.mrb[0].mxu0 %v337_v18  ;;  %2766 = vmatmul.mubr.f32.vlgmr.msra.gmra.mrb[0].mxu1 %v803_v19  ;;  %v2625_v18 = vld [vmem:[#allocation8 + $0x16] ss:$0 sm:$0xff]  ;;  %v2599_v19 = vld [vmem:[#allocation8 + $0x6] ss:$0 sm:$0xff] }
  0x96   : > { %2884 = vmatpush3.bf16.msra.mxu0 %v3576_v13  ;;  %2902 = vmatpush3.bf16.msra.mxu1 %v3576_v13 }
  0x97   : > { %2730 = vmatprep.mubr.msk.f32.mxu0 %vm3300_vm0, %v3301_v1  ;;  %2772 = vmatprep.mubr.msk.f32.mxu1 %vm3300_vm0, %v3301_v1 }
  0x98   : > { %2885 = vmatprep.subr.bf16.mxu0 %v3299_v0  ;;  %2903 = vmatprep.subr.bf16.mxu1 %v3299_v0 }
  0x9d   : > { %2731 = vmatmul.mubr.f32.vlgmr.msra.gmra.mrb[0].mxu0 %v338_v23  ;;  %2773 = vmatmul.mubr.f32.vlgmr.msra.gmra.mrb[0].mxu1 %v804_v24  ;;  %v2612_v23 = vld [vmem:[#allocation8 + $0xf] ss:$0 sm:$0xff]  ;;  %v2595_v24 = vld [vmem:[#allocation8 + $0x3] ss:$0 sm:$0xff] }
  0x9e   : > { %2887 = vmatpush3.bf16.msra.mxu0 %v3624_v37  ;;  %2905 = vmatpush3.bf16.msra.mxu1 %v3624_v37 }
  0x9f   : > { %2737 = vmatprep.mubr.msk.f32.mxu0 %vm3300_vm0, %v3301_v1  ;;  %2779 = vmatprep.mubr.msk.f32.mxu1 %vm3300_vm0, %v3301_v1 }
  0xa0   : > { %2888 = vmatprep.subr.bf16.mxu0 %v3299_v0  ;;  %2906 = vmatprep.subr.bf16.mxu1 %v3299_v0 }
  0xa5   : > { %2738 = vmatmul.mubr.f32.vlgmr.msra.gmra.mrb[0].mxu0 %v3570_v10  ;;  %2780 = vmatmul.mubr.f32.vlgmr.msra.gmra.mrb[0].mxu1 %v3578_v14 }
  0xa6   : > { %2890 = vmatpush3.bf16.msra.mxu0 %v3576_v13  ;;  %2908 = vmatpush3.bf16.msra.mxu1 %v3576_v13 }
  0xa7   : > { %2744 = vmatprep.mubr.msk.f32.mxu0 %vm3300_vm0, %v3301_v1  ;;  %2786 = vmatprep.mubr.msk.f32.mxu1 %vm3300_vm0, %v3301_v1 }
  0xa8   : > { %2909 = vmatprep.subr.bf16.mxu0 %v3299_v0  ;;  %2927 = vmatprep.subr.bf16.mxu1 %v3299_v0 }
  0xad   : > { %2745 = vmatmul.mubr.f32.vlgmr.msra.gmra.mrb[0].mxu0 %v3570_v10  ;;  %2787 = vmatmul.mubr.f32.vlgmr.msra.gmra.mrb[0].mxu1 %v3578_v14  ;;  %v2602_v10 = vld [vmem:[#allocation8 + $0x8] ss:$0 sm:$0xff] }
  0xae   : > { %2911 = vmatpush3.bf16.msra.mxu0 %v3576_v13  ;;  %2929 = vmatpush3.bf16.msra.mxu1 %v3576_v13 }
  0xaf   : > { %2793 = vmatprep.mubr.msk.f32.mxu0 %vm3300_vm0, %v3301_v1  ;;  %2835 = vmatprep.mubr.msk.f32.mxu1 %vm3300_vm0, %v3301_v1 }
  0xb0   : > { %2912 = vmatprep.subr.bf16.mxu0 %v3299_v0  ;;  %2930 = vmatprep.subr.bf16.mxu1 %v3299_v0 }
  0xb1   : > { %2794 = vmatmul.mubr.f32.vlgmr.msra.gmra.mrb[2].mxu0 %v1272_v48  ;;  %2836 = vmatmul.mubr.f32.vlgmr.msra.gmra.mrb[2].mxu1 %v1738_v49 }
  0xb2   : > { %2914 = vmatpush3.bf16.msra.mxu0 %v3592_v33  ;;  %2932 = vmatpush3.bf16.msra.mxu1 %v3592_v33 }
  0xb3   : > { %2800 = vmatprep.mubr.msk.f32.mxu0 %vm3300_vm0, %v3301_v1  ;;  %2842 = vmatprep.mubr.msk.f32.mxu1 %vm3300_vm0, %v3301_v1 }
  0xb4   : > { %2915 = vmatprep.subr.bf16.mxu0 %v3299_v0  ;;  %2933 = vmatprep.subr.bf16.mxu1 %v3299_v0 }
  0xb9   : > { %2801 = vmatmul.mubr.f32.vlgmr.msra.gmra.mrb[2].mxu0 %v3628_v40  ;;  %2843 = vmatmul.mubr.f32.vlgmr.msra.gmra.mrb[2].mxu1 %v3631_v41 }
  0xba   : > { %2917 = vmatpush3.bf16.msra.mxu0 %v3602_v34  ;;  %2935 = vmatpush3.bf16.msra.mxu1 %v3602_v34 }
  0xbb   : > { %2807 = vmatprep.mubr.msk.f32.mxu0 %vm3300_vm0, %v3301_v1  ;;  %2849 = vmatprep.mubr.msk.f32.mxu1 %vm3300_vm0, %v3301_v1 }
  0xbc   : > { %2918 = vmatprep.subr.bf16.mxu0 %v3299_v0  ;;  %2936 = vmatprep.subr.bf16.mxu1 %v3299_v0 }
  0xc1   : > { %2808 = vmatmul.mubr.f32.vlgmr.msra.gmra.mrb[2].mxu0 %v1269_v42  ;;  %2850 = vmatmul.mubr.f32.vlgmr.msra.gmra.mrb[2].mxu1 %v1735_v43  ;;  %v2618_v42 = vld [vmem:[#allocation8 + $0x12] ss:$0 sm:$0xff]  ;;  %v2626_v43 = vld [vmem:[#allocation8 + $0x17] ss:$0 sm:$0xff] }
  0xc2   : > { %2920 = vmatpush3.bf16.msra.mxu0 %v3576_v13  ;;  %2938 = vmatpush3.bf16.msra.mxu1 %v3576_v13 }
  0xc3   : > { %2814 = vmatprep.mubr.msk.f32.mxu0 %vm3300_vm0, %v3301_v1  ;;  %2856 = vmatprep.mubr.msk.f32.mxu1 %vm3300_vm0, %v3301_v1 }
  0xc4   : > { %2921 = vmatprep.subr.bf16.mxu0 %v3299_v0  ;;  %2939 = vmatprep.subr.bf16.mxu1 %v3299_v0 }
  0xc9   : > { %2815 = vmatmul.mubr.f32.vlgmr.msra.gmra.mrb[2].mxu0 %v1270_v44  ;;  %2857 = vmatmul.mubr.f32.vlgmr.msra.gmra.mrb[2].mxu1 %v1736_v45 }
  0xca   : > { %2923 = vmatpush3.bf16.msra.mxu0 %v3624_v37  ;;  %2941 = vmatpush3.bf16.msra.mxu1 %v3624_v37 }
  0xcb   : > { %2821 = vmatprep.mubr.msk.f32.mxu0 %vm3300_vm0, %v3301_v1  ;;  %2863 = vmatprep.mubr.msk.f32.mxu1 %vm3300_vm0, %v3301_v1 }
  0xcc   : > { %2924 = vmatprep.subr.bf16.mxu0 %v3299_v0  ;;  %2942 = vmatprep.subr.bf16.mxu1 %v3299_v0 }
  0xd1   : > { %2822 = vmatmul.mubr.f32.vlgmr.msra.gmra.mrb[2].mxu0 %v3628_v40  ;;  %2864 = vmatmul.mubr.f32.vlgmr.msra.gmra.mrb[2].mxu1 %v3631_v41 }
  0xd2   : > { %2926 = vmatpush3.bf16.msra.mxu0 %v3576_v13  ;;  %2944 = vmatpush3.bf16.msra.mxu1 %v3576_v13 }
  0xd3   : > { %2828 = vmatprep.mubr.msk.f32.mxu0 %vm3300_vm0, %v3301_v1  ;;  %2870 = vmatprep.mubr.msk.f32.mxu1 %vm3300_vm0, %v3301_v1 }
  0xd9   : > { %2829 = vmatmul.mubr.f32.vlgmr.msra.gmra.mrb[2].mxu0 %v3628_v40  ;;  %2871 = vmatmul.mubr.f32.vlgmr.msra.gmra.mrb[2].mxu1 %v3631_v41  ;;  %v2604_v41 = vld [vmem:[#allocation8 + $0xa] ss:$0 sm:$0xff] }
  0xfa   : > { %v3710_v4 = vpop.permute.xlu1 %2445  ;;  %v2229_v6 = vpop.permute.xlu0 %2228 }
  0xfe   : > { %v2338_v37 = vpop.permute.xlu0 %2337  ;;  %v2178_v39 = vpop.permute.xlu1 %2177 }
 0x180   : > { %v724_v50 = vpop.f32.mrb[0].mxu0  ;;  %v1190_v51 = vpop.f32.mrb[0].mxu1 }
 0x181   : > { %729 = vst.msk [vmem:[#allocation2] sm:$0xff] %vm728_vm2, %v724_v50  ;;  %v2746_v52 = vpop.f32.mrb[1].mxu0  ;;  %1195 = vst.msk [vmem:[#allocation2 + $0x8] sm:$0xff] %vm728_vm2, %v1190_v51  ;;  %v2788_v53 = vpop.f32.mrb[1].mxu1  ;;  %v2605_v51 = vld [vmem:[#allocation8 + $0xb] ss:$0 sm:$0xff] }
 0x182   : > { %v2619_v52 = vld [vmem:[#allocation8 + $0x13] ss:$0 sm:$0xff] }
 0x188   : > { %v2128_v60 = vld [vmem:[#allocation2] sm:$0xff]  ;;  %v2129_v1 = vld [vmem:[#allocation2 + $0x8] sm:$0xff] }
 0x189   : > { %v2407_v5 = vmul.f32 %v2623_v54, %v2128_v60  ;;  %v2190_v7 = vmul.f32 %v2597_v56, %v2128_v60  ;;  %v2299_v8 = vmul.f32 %v2609_v58, %v2128_v60  ;;  %v2139_v9 = vmul.f32 %v2592_v62, %v2128_v60 }
 0x18a   : > { %v2416_v11 = vmul.f32 %v2624_v55, %v2129_v1  ;;  %v2199_v12 = vmul.f32 %v2598_v57, %v2129_v1  ;;  %v2308_v13 = vmul.f32 %v2610_v61, %v2129_v1  ;;  %v2148_v14 = vmul.f32 %v2593_v2, %v2129_v1 }
 0x18b   : > { %v2246_v25 = vmul.f32 %v2602_v10, %v2128_v60  ;;  %v2255_v26 = vmul.f32 %v2603_v15, %v2129_v1  ;;  %v2354_v27 = vmul.f32 %v2616_v16, %v2128_v60  ;;  %v2363_v28 = vmul.f32 %v2617_v17, %v2129_v1 }
 0x18c   : > { %v2417_v30 = vadd.f32 %v2416_v11, %v2407_v5  ;;  %v2200_v31 = vadd.f32 %v2199_v12, %v2190_v7  ;;  %v2309_v32 = vadd.f32 %v2308_v13, %v2299_v8  ;;  %v2149_v33 = vadd.f32 %v2148_v14, %v2139_v9  ;;  %v2286_v7 = vpop.permute.xlu0 %2285  ;;  %v2394_v8 = vpop.permute.xlu1 %2393 }
 0x18d   : > { %v2256_v53 = vadd.f32 %v2255_v26, %v2246_v25  ;;  %v2364_v55 = vadd.f32 %v2363_v28, %v2354_v27 }
 0x1ac   : > { %v1656_v59 = vpop.f32.mrb[2].mxu0  ;;  %v2122_v63 = vpop.f32.mrb[2].mxu1 }
 0x1ad   : > { %1661 = vst.msk [vmem:[#allocation2 + $0x10] sm:$0xff] %vm728_vm2, %v1656_v59  ;;  %v2830_v0 = vpop.f32.mrb[3].mxu0  ;;  %2127 = vst.msk [vmem:[#allocation2 + $0x18] sm:$0xff] %vm728_vm2, %v2122_v63  ;;  %v2872_v3 = vpop.f32.mrb[3].mxu1 }
 0x1b4   : > { %v2130_v29 = vld [vmem:[#allocation2 + $0x10] sm:$0xff]  ;;  %v2131_v34 = vld [vmem:[#allocation2 + $0x18] sm:$0xff] }
 0x1b5   : > { %v2426_v35 = vmul.f32 %v2625_v18, %v2130_v29  ;;  %v2209_v36 = vmul.f32 %v2599_v19, %v2130_v29  ;;  %v2318_v38 = vmul.f32 %v2611_v20, %v2130_v29  ;;  %v2158_v40 = vmul.f32 %v2594_v21, %v2130_v29 }
 0x1b6   : > { %v2219_v44 = vmul.f32 %v2600_v22, %v2131_v34  ;;  %v2328_v45 = vmul.f32 %v2612_v23, %v2131_v34  ;;  %v2168_v46 = vmul.f32 %v2595_v24, %v2131_v34  ;;  %v2265_v54 = vmul.f32 %v2604_v41, %v2130_v29 }
 0x1b7   : > { %v2427_v47 = vadd.f32 %v2426_v35, %v2417_v30  ;;  %v2210_v48 = vadd.f32 %v2209_v36, %v2200_v31  ;;  %v2319_v49 = vadd.f32 %v2318_v38, %v2309_v32  ;;  %v2159_v50 = vadd.f32 %v2158_v40, %v2149_v33 }
 0x1b8   : > { %v2373_v56 = vmul.f32 %v2618_v42, %v2130_v29  ;;  %v2436_v57 = vmul.f32 %v2626_v43, %v2131_v34  ;;  %v2266_v61 = vadd.f32 %v2265_v54, %v2256_v53  ;;  %v2275_v62 = vmul.f32 %v2605_v51, %v2131_v34 }
 0x1b9   : > { %v2220_v58 = vadd.f32 %v2219_v44, %v2210_v48  ;;  %v2329_v59 = vadd.f32 %v2328_v45, %v2319_v49  ;;  %v2169_v60 = vadd.f32 %v2168_v46, %v2159_v50  ;;  %v2383_v0 = vmul.f32 %v2619_v52, %v2131_v34 }
 0x1ba   : > { %v2374_v63 = vadd.f32 %v2373_v56, %v2364_v55  ;;  %v2437_v1 = vadd.f32 %v2436_v57, %v2427_v47  ;;  %v2276_v9 = vadd.f32 %v2275_v62, %v2266_v61 }
 0x1bb   : > { %v2231_v2 = vadd.f32 %v2229_v6, %v2220_v58  ;;  %v2340_v3 = vadd.f32 %v2338_v37, %v2329_v59  ;;  %v2180_v5 = vadd.f32 %v2178_v39, %v2169_v60 }
 0x1bc   : > { %v2384_v10 = vadd.f32 %v2383_v0, %v2374_v63  ;;  %v2288_v11 = vadd.f32 %v2286_v7, %v2276_v9  ;;  %v2448_v13 = vadd.f32 %v3710_v4, %v2437_v1 }
 0x1bd   : > { %2181 = vst.msk [vmem:[%s261_s7] sm:$0xff] %vm728_vm2, %v2180_v5  ;;  %2342 = vrot.lane.b32.xlu1 %v2340_v3, %s3303_s6  ;;  %2233 = vrot.lane.b32.xlu0 %v2231_v2, %s3303_s6 }
 0x1be   : > { %v2396_v12 = vadd.f32 %v2394_v8, %v2384_v10  ;;  %2608 = vst.msk [vmem:[%s261_s7 + $0x8] sm:$0xff] %vm728_vm2, %v2288_v11 }
 0x1c0   : > { %2622 = vst.msk [vmem:[%s261_s7 + $0x10] sm:$0xff] %vm728_vm2, %v2396_v12 }
 0x1c1   : > { %2450 = vrot.lane.b32.xlu0 %v2448_v13, %s3303_s6 }
 0x22f   : > { %v2343_v6 = vpop.permute.xlu1 %2342  ;;  %v2234_v14 = vpop.permute.xlu0 %2233 }
 0x230   : > { %2615 = vst.msk [vmem:[%s261_s7 + $0x8] sm:$0xff] %vm2236_vm3, %v2343_v6  ;;  %2237 = vst.msk [vmem:[%s261_s7] sm:$0xff] %vm2236_vm3, %v2234_v14 }
 0x233   : > { %v2451_v4 = vpop.permute.xlu0 %2450 }
 0x234   : > { %2629 = vst.msk [vmem:[%s261_s7 + $0x10] sm:$0xff] %vm2236_vm3, %v2451_v4 }
 0x235   : > { %3200 = shalt.err (!%p3197_p5)
}
 0x236   : > { %s3201_s13 = scalar_lea.hbm %s3724_s1, 384  ;;  %s3205_s7 = scalar_lea.hbm %s3782_s4, 1536 }
 0x237   : > { %p3202_p0 = scmp.ne.s32.totalorder %s3724_s1, %s3201_s13  ;;  %p3206_p11 = scmp.lt.u32.totalorder %s3724_s1, %s3782_s4 }
 0x238   : > { %p3207_p1 = scmp.lt.u32.totalorder %s3205_s7, %s3201_s13  ;;  %p3209_p12 = scmp.lt.u32.totalorder %s3201_s13, %s3724_s1 }
 0x239   : > { %p3203_p4 = pnand %p3202_p0, %p3809_p13 }
 0x23a   : > { %p3208_p2 = por %p3207_p1, %p3206_p11 }
 0x23b   : > { %p3204_p10 = pneg %p3203_p4 }
 0x23c   : > { %p3210_p3 = por %p3209_p12, %p3208_p2 }
 0x23e   : > { %p3211_p7 = pnand %p3210_p3, %p3204_p10 }
 0x240   : > { %3214 = shalt.err (!%p3211_p7)
}
 0x241   : > { %s3305_s10 = smov 128   ;;  %s3306_s11 = smov 256  }
 0x242   : > { %s3307_s9 = smov 8  }
 0x243   : > { %2997 = dma.vmem_to_hbm [thread:$0]  (%p3809_p13), %s3719_s25, 384, %s3724_s1, %s2455_s18, %s3305_s10, %s3306_s11, %s3307_s9  }
 0x244 PF: > { %s3810_s15 = sld [smem:[#allocation13_spill]]  ;;  %s3811_s19 = sld [smem:[#allocation14_spill]] }
 0x245   : > { %p3019_p6 = scmp.ge.s32.totalorder %s3289_s22, 2 }
 0x24a   : > { %s2484_s26 = sand.u32 1, %s3810_s15   ;;  %p3812_p8 = scmp.ne.s32.totalorder %s3811_s19, 0 }
 0x24b   : > { %s2485_s28 = scalar_lea.sflag [#allocation5], %s2484_s26 }
 0x24c   : > { %p3011_p9 = pnand %p3019_p6, %p3812_p8 }
 0x24e   : > { %3256 = dma.done.wait (!%p3011_p9), %s2485_s28, 384  }
 0x24f   : > { %3258 = vsyncadd (!%p3011_p9), %s2485_s28, 4294966912  ;;  %s21_s22 = sadd.s32 1, %s3289_s22   ;;  %s3813_s15 = smov %s3265_s16 }
 0x250   : > { %p18_p5 = scmp.ge.s32.totalorder %s21_s22, 6   ;;  %s3814_s16 = smov %s3269_s17 }
 0x251   : > { %s3815_s17 = smov %s3542_s30  ;;  %s3816_s18 = smov %s3281_s20 }
 0x252   : > { %s3817_s19 = smov %s3285_s21  ;;  %s3818_s20 = smov %s3821_s23 }
 0x253   : > { %s3819_s21 = smov %s3825_s24  ;;  %20 = sbr.rel (!%p18_p5) target bundleno = 10 (0xa), region = 122 }
 0x25a   :  { %2490 = vsyncpa [#allocation4], 1 }
 0x25b   :  { %2492 = vsyncpa [#allocation4 + $0x1], 1 }
 0x25c   :  { %2493 = vsyncpa [#allocation7], 1 }
 0x25d   :  { %2494 = vsyncpa [#allocation5], 1 }
 0x25e   :  { %2496 = vsyncpa [#allocation5 + $0x1], 1 }

</bundles_post_ra>
